<compile_context>
chip_gen: v7x
topology: tpu7x:2x2x1
jax: 0.10.0
libtpu: 0.0.40
codegen_flags: <defaults>
</compile_context>

<pallas_src>
import math

import jax
import jax.numpy as jnp
from jax.experimental import pallas as pl
from jax.experimental.pallas import tpu as pltpu

_MIN_PALLAS_BYTES = 1 << 20  # below this, kernel dispatch overhead dominates
_MIN_PIPELINE_BYTES = 2 << 20  # above this, force >= _MIN_STEPS grid steps
_MIN_STEPS = 4


def _add_pe_kernel(x_ref, pe_ref, o_ref):
    # x_ref: (tile_r, cols), pe_ref: (1, cols) resident in VMEM.
    # Sublane-broadcast add on the VPU; fully hidden under the x/out DMAs.
    # TODO(synk): a stride-0 sublane-broadcast read (pe_ref[pl.ds(0, tr, stride=0)])
    # and pipeline_mode=pl.Buffered(1) on the pe spec are further micro-opts;
    # omitted here since the add is already DMA-bound and they add lowering risk.
    o_ref[...] = x_ref[...] + pe_ref[...]


def make_positional_encoding(d_model: int, max_len: int = 40,
                             dtype=jnp.float32) -> jax.Array:
    """Sinusoidal table matching the PyTorch __init__, WITHOUT the redundant
    batch dimension (pe is identical across batch in the original)."""
    position = jnp.arange(0, max_len, dtype=jnp.float32)[:, None]           # (L, 1)
    div_term = jnp.exp(jnp.arange(0, d_model, 2, dtype=jnp.float32)
                       * (-math.log(10000.0) / d_model))                    # (ceil(D/2),)
    angles = position * div_term                                            # (L, ceil(D/2))
    pe = jnp.zeros((max_len, d_model), dtype=jnp.float32)
    pe = pe.at[:, 0::2].set(jnp.sin(angles))
    # Guard odd d_model (the PyTorch original would fail there).
    pe = pe.at[:, 1::2].set(jnp.cos(angles[:, : d_model // 2]))
    return pe.astype(dtype)


def _vmem_limit_bytes() -> int:
    """Generation-aware scoped-VMEM limit: ~half of physical VMEM, capped at
    48 MiB (=> ~32 MiB on v7x's 64 MiB, 48 MiB on v5e/v6e's 128 MiB), and never
    below 16 MiB."""
    try:
        cap = int(pltpu.get_tpu_info().vmem_capacity_bytes)
    except Exception:
        cap = 64 << 20  # conservative (v7x) fallback
    return int(min(48 << 20, max(16 << 20, cap // 2)))


def _row_granularity(itemsize: int) -> int:
    # Sub-32-bit dtypes pack along sublanes: keep packed vregs full at edges.
    return {4: 8, 2: 16, 1: 32}.get(itemsize, 8)


def _pick_row_tile(rows: int, row_bytes: int, itemsize: int,
                   target_bytes: int, total_bytes: int) -> int:
    """Row-block size: ~target_bytes per buffer, multiple of the dtype-aware
    sublane granularity (or the full extent), and capped so that sufficiently
    large inputs get >= _MIN_STEPS grid steps (DMA pipelining + megacore)."""
    gran = _row_granularity(itemsize)
    if rows <= gran:
        return rows
    tile = max(gran, (target_bytes // max(row_bytes, 1)) // gran * gran)
    if total_bytes >= _MIN_PIPELINE_BYTES:
        cap = ((pl.cdiv(rows, _MIN_STEPS) + gran - 1) // gran) * gran
        tile = min(tile, max(gran, cap))
    return min(tile, rows)


def positional_encoding_forward(x: jax.Array, pe: jax.Array, *,
                                force_pallas: bool = False,
                                donate_x: bool = False) -> jax.Array:
    """forward(x): x + pe (pe broadcast over batch)."""
    B, L, D = x.shape
    if pe.shape[0] < L or pe.shape[1] < D:
        raise ValueError(f"pe table {pe.shape} too small for input ({L}, {D})")
    pe = pe[:L, :D].astype(x.dtype)
    itemsize = jnp.dtype(x.dtype).itemsize
    total_bytes = B * L * D * itemsize

    # Tiny-input dispatch: kernel launch overhead would be ~100% of runtime.
    if not force_pallas and total_bytes < _MIN_PALLAS_BYTES:
        return x + pe[None, :, :]

    # Lane-dense flattening (free layout plumbing for an elementwise op).
    cols = L * D
    x2 = x.reshape(B, cols)
    pe2 = pe.reshape(1, cols)

    # Pad to a 128-lane multiple so output stores are unmasked vst.
    cols_p = ((cols + 127) // 128) * 128
    if cols_p != cols:
        x2 = jnp.pad(x2, ((0, 0), (0, cols_p - cols)))
        pe2 = jnp.pad(pe2, ((0, 0), (0, cols_p - cols)))

    vmem_limit = _vmem_limit_bytes()
    pe_bytes = cols_p * itemsize
    # 2 streams (x, out) x 2 pipeline buffers each, plus the resident pe row.
    tile_target = max(256 << 10, min(6 << 20, (vmem_limit - 2 * pe_bytes) // 5))
    tile_r = _pick_row_tile(B, cols_p * itemsize, itemsize, tile_target,
                            total_bytes)
    grid = (pl.cdiv(B, tile_r),)

    # TODO(synk): for extremely large L*D (not this module's max_len=40 regime)
    # also tile the column axis in 128-multiples, budgeting per-generation
    # (v7x has half the VMEM of v5e/v6e).
    out2 = pl.pallas_call(
        _add_pe_kernel,
        out_shape=jax.ShapeDtypeStruct((B, cols_p), x.dtype),
        grid_spec=pltpu.PrefetchScalarGridSpec(
            num_scalar_prefetch=0,
            grid=grid,
            in_specs=[
                pl.BlockSpec((tile_r, cols_p), lambda i: (i, 0)),
                # Constant block index -> pe fetched once, stays VMEM-resident.
                pl.BlockSpec((1, cols_p), lambda i: (0, 0)),
            ],
            out_specs=pl.BlockSpec((tile_r, cols_p), lambda i: (i, 0)),
        ),
        compiler_params=pltpu.CompilerParams(
            dimension_semantics=("parallel",),
            vmem_limit_bytes=vmem_limit,
        ),
        input_output_aliases=({0: 0} if donate_x else {}),
    )(x2, pe2)

    if cols_p != cols:
        out2 = out2[:, :cols]
    return out2.reshape(B, L, D)


if __name__ == "__main__":
    # Small shapes consistent with the module: batch=2, seq=8, d_model=32.
    B, L, D = 2, 8, 32

    key = jax.random.PRNGKey(0)
    x = jax.random.normal(key, (B, L, D), dtype=jnp.float32)

    pe = make_positional_encoding(d_model=D, max_len=L)
    ref = x + pe[None, :, :]

    # Exercise the Pallas kernel path explicitly (shape is below the tiny-input
    # dispatch threshold, so force it).
    out = positional_encoding_forward(x, pe, force_pallas=True)
    out = jax.block_until_ready(out)
    assert out.shape == (B, L, D)
    assert jnp.allclose(out, ref, atol=1e-6), "pallas path mismatch vs reference"

    # Default dispatch path (tiny input -> plain x + pe) must agree too.
    out_small = jax.block_until_ready(positional_encoding_forward(x, pe))
    assert jnp.allclose(out_small, ref, atol=1e-6), "dispatch path mismatch"

    print("KERNEL_OK")
</pallas_src>

<mosaic_0001>
module attributes {stable_mosaic.version = 11 : i64} {
  func.func @_add_pe_kernel(%arg0: i32, %arg1: memref<2x256xf32, #tpu.memory_space<vmem>>, %arg2: memref<1x256xf32, #tpu.memory_space<vmem>>, %arg3: memref<2x256xf32, #tpu.memory_space<vmem>>) attributes {dimension_semantics = [#tpu.dimension_semantics<parallel>], iteration_bounds = array<i64: 1>, scalar_prefetch = 0 : i64, scratch_operands = 0 : i64, tpu.core_type = #tpu.core_type<tc>, window_params = [{transform_indices = @transform_0, window_bounds = array<i64: 2, 256>}, {pipeline_mode = #tpu.pipeline_mode<synchronous>, transform_indices = @transform_1, window_bounds = array<i64: 1, 256>}, {transform_indices = @transform_2, window_bounds = array<i64: 2, 256>}]} {
    %c0 = arith.constant 0 : index
    %c0_0 = arith.constant 0 : index
    %0 = vector.load %arg1[%c0, %c0_0] : memref<2x256xf32, #tpu.memory_space<vmem>>, vector<2x256xf32>
    %c0_1 = arith.constant 0 : index
    %c0_2 = arith.constant 0 : index
    %1 = vector.load %arg2[%c0_1, %c0_2] : memref<1x256xf32, #tpu.memory_space<vmem>>, vector<1x256xf32>
    %2 = vector.broadcast %1 : vector<1x256xf32> to vector<2x256xf32>
    %3 = arith.addf %0, %2 : vector<2x256xf32>
    %c0_3 = arith.constant 0 : index
    %c0_4 = arith.constant 0 : index
    %4 = vector.load %arg3[%c0_3, %c0_4] : memref<2x256xf32, #tpu.memory_space<vmem>>, vector<2x256xf32>
    tpu.vector_store %arg3[%c0_3, %c0_4], %3 {strides = array<i32>} : memref<2x256xf32, #tpu.memory_space<vmem>>, vector<2x256xf32>,
    return
  }
  func.func @transform_0(%arg0: i32) -> (i32, i32) {
    %c0_i32 = arith.constant 0 : i32
    %c0_i32_0 = arith.constant 0 : i32
    return %arg0, %c0_i32 : i32, i32
  }
  func.func @transform_1(%arg0: i32) -> (i32, i32) {
    %c0_i32 = arith.constant 0 : i32
    %c0_i32_0 = arith.constant 0 : i32
    %c0_i32_1 = arith.constant 0 : i32
    return %c0_i32, %c0_i32_0 : i32, i32
  }
  func.func @transform_2(%arg0: i32) -> (i32, i32) {
    %c0_i32 = arith.constant 0 : i32
    %c0_i32_0 = arith.constant 0 : i32
    return %arg0, %c0_i32 : i32, i32
  }
}

</mosaic_0001>

<bundles_post_ra>
// kernel: tpu_custom_call.1
= control target key start
LH: loop header
LB: loop body
LE: loop exit
PB: predicated region body
PF: predicated region fallthrough
CT: control target
= control target key end

     0   :  { %7 = vsyncpa [#allocation3], 0  ;;  %s157_s0 = inlined_call_operand.hbm [shape: f32[2,256], index: 0, kind: input, shape index: {}]   ;;  %s158_s1 = inlined_call_operand.vmem [shape: f32[1,256], index: 1, kind: input, shape index: {}]   ;;  %s159_s2 = inlined_call_operand.hbm [shape: f32[2,256], index: 2, kind: output, shape index: {}]  }
   0x1   :  { %8 = vsyncpa [#allocation4], 0  ;;  %s112_s9 = smov [#allocation2]   ;;  %s64_s13 = scalar_lea.hbm %s157_s0, 64 }
   0x2   :  { %s15_s10 = sshll.u32 %s112_s9, 4  ;;  %p65_p0 = scmp.ne.s32.totalorder %s157_s0, %s64_s13  ;;  %s16_s10 = int_to_ptr.vmem [resolvable:$true] %s15_s10 }
   0x3   :  { %p68_p1 = scmp.lt.u32.totalorder %s64_s13, %s157_s0 }
   0x5   :  { %p70_p2 = pnand %p68_p1, %p65_p0 }
   0x7   :  { %73 = shalt.err (!%p70_p2)
}
   0x8   :  { %s74_s18 = scalar_lea.vmem %s16_s10, 64  ;;  %p79_p4 = scmp.lt.s32.totalorder %s16_s10, %s16_s10 }
   0x9   :  { %p75_p3 = scmp.ne.s32.totalorder %s16_s10, %s74_s18  ;;  %p80_p5 = scmp.lt.s32.totalorder %s74_s18, %s74_s18 }
   0xb   :  { %p81_p6 = por %p80_p5, %p79_p4 }
   0xd   :  { %p82_p7 = pnand %p81_p6, %p75_p3 }
   0xf   :  { %85 = shalt.err (!%p82_p7)
}
  0x10   :  { %18 = dma.hbm_to_vmem [thread:$0]  %s157_s0, 64, %s16_s10, [#allocation3]  }
  0x11   :  { %108 = dma.done.wait [#allocation3], 64  }
  0x12   :  { %109 = vsyncadd [#allocation3], 4294967232  ;;  %v27_v0 = vlaneseq  ;;  %v113_v1 = vmov 1983009808   ;;  %v25_v7 = vld [vmem:[%s158_s1] sm:$0x3] }
  0x13   :  { %v37_v2 = vunpack.c.l.s4 %v113_v1  ;;  %v24_v12 = vld [vmem:[#allocation2] sm:$0xf]  ;;  %s114_s23 = smov [#allocation5]  }
  0x14   :  { %v28_v3 = vshrl.u32 %v27_v0, 7  ;;  %s52_s0 = sshll.u32 %s114_s23, 4  ;;  %s53_s0 = int_to_ptr.vmem [resolvable:$true] %s52_s0 }
  0x15   :  { %v38_v6 = vunpack.c.0.s8 %v37_v2  ;;  %s86_s24 = scalar_lea.vmem %s53_s0, 64  ;;  %p91_p9 = scmp.lt.s32.totalorder %s53_s0, %s53_s0 }
  0x16   :  { %v29_v4 = vsub.s32 0, %v28_v3  ;;  %v33_v5 = vsub.s32 1, %v28_v3  ;;  %p87_p8 = scmp.ne.s32.totalorder %s53_s0, %s86_s24  ;;  %p92_p10 = scmp.lt.s32.totalorder %s86_s24, %s86_s24 }
  0x17   :  { %v41_v10 = vsub.s32 %v38_v6, %v28_v3 }
  0x18   :  { %v30_v8 = vrot.slane %v25_v7, %v29_v4  ;;  %v34_v9 = vrot.slane %v25_v7, %v33_v5  ;;  %p93_p11 = por %p92_p10, %p91_p9 }
  0x1a   :  { %v35_v11 = vcombine.low %v30_v8, %v34_v9  ;;  %p94_p12 = pnand %p93_p11, %p87_p8 }
  0x1c   :  { %v42_v13 = vrot.slane %v35_v11, %v41_v10 }
  0x1e   :  { %v44_v14 = vadd.f32 %v42_v13, %v24_v12 }
  0x20   :  { %45 = vst [vmem:[#allocation5] sm:$0xf] %v44_v14 }
  0x21   :  { %97 = shalt.err (!%p94_p12)
}
  0x22   :  { %s98_s26 = scalar_lea.hbm %s159_s2, 64 }
  0x23   :  { %p99_p13 = scmp.ne.s32.totalorder %s159_s2, %s98_s26  ;;  %p102_p0 = scmp.lt.u32.totalorder %s98_s26, %s159_s2 }
  0x25   :  { %p104_p1 = pnand %p102_p0, %p99_p13 }
  0x27   :  { %107 = shalt.err (!%p104_p1)
}
  0x28   :  { %55 = dma.vmem_to_hbm [thread:$0]  %s53_s0, 64, %s159_s2, [#allocation4]  }
  0x29   :  { %110 = dma.done.wait [#allocation4], 64  }
  0x2a   :  { %111 = vsyncadd [#allocation4], 4294967232 }
  0x2b   :  { %59 = vsyncpa [#allocation3], 1 }
  0x2c   :  { %60 = vsyncpa [#allocation4], 1 }

</bundles_post_ra>
